<compile_context>
chip_gen: v5e
topology: v5e:2x2
jax: 0.10.0
libtpu: 0.0.40
codegen_flags: <defaults>
</compile_context>

<pallas_src>
import math

import jax
import jax.numpy as jnp
from jax.experimental import pallas as pl
from jax.experimental.pallas import tpu as pltpu


# ----------------------------------------------------------------------------------
# Kernels
# ----------------------------------------------------------------------------------
def _pool_linear_relu_kernel(d_ref, h_ref, w_ref, b_ref, o_ref):
    # d_ref: (TB, S*D)  h_ref: (TB, S*D)  w_ref: (S*D, D*D)  b_ref: (1, D*D)
    x = d_ref[...] * h_ref[...]                      # lane-dense elementwise (VPU)
    y = jnp.dot(x, w_ref[...], preferred_element_type=jnp.float32) + b_ref[...]
    o_ref[...] = jnp.maximum(y, 0.0).astype(o_ref.dtype)


def _linear_relu_kernel(x_ref, w_ref, b_ref, o_ref):
    # x_ref: (TB, D)  w_ref: (D, D*D)  b_ref: (1, D*D)
    y = jnp.dot(x_ref[...], w_ref[...], preferred_element_type=jnp.float32) + b_ref[...]
    o_ref[...] = jnp.maximum(y, 0.0).astype(o_ref.dtype)


# ----------------------------------------------------------------------------------
# Gridded wrapper: tiles the batch dim, pins weight/bias, pads B if needed.
# ----------------------------------------------------------------------------------
def _fused_forward(kernel, row_inputs, pinned_inputs, n_out, *, tb=256):
    B = row_inputs[0].shape[0]
    if B <= tb:
        TB, B_pad = B, B                              # single full-extent block
    else:
        TB = tb
        B_pad = pl.cdiv(B, TB) * TB
        if B_pad != B:
            row_inputs = [jnp.pad(x, ((0, B_pad - B), (0, 0))) for x in row_inputs]

    in_specs = (
        [pl.BlockSpec((TB, x.shape[1]), lambda i: (i, 0)) for x in row_inputs]
        + [pl.BlockSpec(p.shape, lambda i: (0, 0)) for p in pinned_inputs]
    )
    out = pl.pallas_call(
        kernel,
        out_shape=jax.ShapeDtypeStruct((B_pad, n_out), jnp.float32),
        grid_spec=pltpu.PrefetchScalarGridSpec(
            num_scalar_prefetch=0,
            grid=(B_pad // TB,),
            in_specs=in_specs,
            out_specs=pl.BlockSpec((TB, n_out), lambda i: (i, 0)),
        ),
        compiler_params=pltpu.CompilerParams(dimension_semantics=("parallel",)),
    )(*row_inputs, *pinned_inputs)
    return out[:B] if B_pad != B else out


# ----------------------------------------------------------------------------------
# Model
# ----------------------------------------------------------------------------------
class AvgModel:
    def __init__(self, D, key, compute_dtype=jnp.float32):
        self.D = D
        self.compute_dtype = compute_dtype            # set jnp.bfloat16 on v6e/v7x for MXU density
        kw, kb = jax.random.split(key)
        # nn.Linear(D, D*D) init: uniform(-1/sqrt(D), 1/sqrt(D)) for weight and bias.
        bound = 1.0 / math.sqrt(D)
        w = jax.random.uniform(kw, (D * D, D), jnp.float32, -bound, bound)   # torch (out, in)
        self.w_t = jnp.asarray(w.T).astype(compute_dtype)                    # (D, D*D)
        self.bias = jax.random.uniform(kb, (1, D * D), jnp.float32, -bound, bound)
        self._w_rep_cache = {}                        # per-S replicated weight, built once

    def _w_rep(self, S):
        w = self._w_rep_cache.get(S)
        if w is None:
            # Row s*D + j of W_rep is w_t[j]; matches d.reshape(B, S*D) index order.
            w = jnp.tile(self.w_t, (S, 1))            # (S*D, D*D)
            self._w_rep_cache[S] = w
        return w

    def forward(self, avg, *args):
        D = self.D
        if avg:
            (d,) = args
            dm = d[:, 0, :].astype(self.compute_dtype)           # exact slice, NaN-safe
            M = _fused_forward(_linear_relu_kernel, [dm],
                               [self.w_t, self.bias], D * D)
        else:
            d, h = args
            B, S, _ = d.shape
            d_flat = d.reshape(B, S * D).astype(self.compute_dtype)   # lane-dense (B, S*D)
            h_rep = jnp.repeat(h, D, axis=1).astype(self.compute_dtype)  # (B, S*D)
            M = _fused_forward(_pool_linear_relu_kernel, [d_flat, h_rep],
                               [self._w_rep(S), self.bias], D * D)
        return M.reshape(-1, D, D)                    # free reshape in glue


# ----------------------------------------------------------------------------------
# Demo / self-check
# ----------------------------------------------------------------------------------
if __name__ == "__main__":
    D, S = 16, 8

    key = jax.random.PRNGKey(0)
    kmod, kd, kh, kd2, kh2 = jax.random.split(key, 5)

    model = AvgModel(D, kmod)

    def ref(dm):
        w32 = model.w_t.astype(jnp.float32)
        return jnp.maximum(dm @ w32 + model.bias, 0.0).reshape(-1, D, D)

    # --- small batch (B=2): single full-extent block ----------------------------
    B = 2
    d = jax.random.normal(kd, (B, S, D), jnp.float32)
    h = jax.nn.softmax(jax.random.normal(kh, (B, S), jnp.float32), axis=-1)

    out_ws = jax.block_until_ready(model.forward(False, d, h))
    out_avg = jax.block_until_ready(model.forward(True, d))

    ref_ws = ref(jnp.sum(d * h[:, :, None], axis=1))
    ref_avg = ref(d[:, 0, :])

    assert out_ws.shape == (B, D, D) and out_avg.shape == (B, D, D)
    assert bool(jnp.allclose(out_ws, ref_ws, atol=1e-5, rtol=1e-5))
    assert bool(jnp.allclose(out_avg, ref_avg, atol=1e-5, rtol=1e-5))

    # --- larger batch (B=300): exercises grid=(2,), padding, "parallel" axis ----
    B2 = 300
    d2 = jax.random.normal(kd2, (B2, S, D), jnp.float32)
    h2 = jax.nn.softmax(jax.random.normal(kh2, (B2, S), jnp.float32), axis=-1)

    out2_ws = jax.block_until_ready(model.forward(False, d2, h2))
    out2_avg = jax.block_until_ready(model.forward(True, d2))

    ref2_ws = ref(jnp.sum(d2 * h2[:, :, None], axis=1))
    ref2_avg = ref(d2[:, 0, :])

    assert out2_ws.shape == (B2, D, D) and out2_avg.shape == (B2, D, D)
    assert bool(jnp.all(jnp.isfinite(out2_ws))) and bool(jnp.all(jnp.isfinite(out2_avg)))
    assert bool(jnp.allclose(out2_ws, ref2_ws, atol=1e-5, rtol=1e-5))
    assert bool(jnp.allclose(out2_avg, ref2_avg, atol=1e-5, rtol=1e-5))

    print("KERNEL_OK")
</pallas_src>

<mosaic_0001>
module attributes {stable_mosaic.version = 11 : i64} {
  func.func @_pool_linear_relu_kernel(%arg0: i32, %arg1: memref<2x128xf32, #tpu.memory_space<vmem>>, %arg2: memref<2x128xf32, #tpu.memory_space<vmem>>, %arg3: memref<128x256xf32, #tpu.memory_space<vmem>>, %arg4: memref<1x256xf32, #tpu.memory_space<vmem>>, %arg5: memref<2x256xf32, #tpu.memory_space<vmem>>) attributes {dimension_semantics = [#tpu.dimension_semantics<parallel>], iteration_bounds = array<i64: 1>, scalar_prefetch = 0 : i64, scratch_operands = 0 : i64, tpu.core_type = #tpu.core_type<tc>, window_params = [{transform_indices = @transform_0, window_bounds = array<i64: 2, 128>}, {transform_indices = @transform_1, window_bounds = array<i64: 2, 128>}, {pipeline_mode = #tpu.pipeline_mode<synchronous>, transform_indices = @transform_2, window_bounds = array<i64: 128, 256>}, {pipeline_mode = #tpu.pipeline_mode<synchronous>, transform_indices = @transform_3, window_bounds = array<i64: 1, 256>}, {transform_indices = @transform_4, window_bounds = array<i64: 2, 256>}]} {
    %c0 = arith.constant 0 : index
    %c0_0 = arith.constant 0 : index
    %0 = vector.load %arg1[%c0, %c0_0] : memref<2x128xf32, #tpu.memory_space<vmem>>, vector<2x128xf32>
    %c0_1 = arith.constant 0 : index
    %c0_2 = arith.constant 0 : index
    %1 = vector.load %arg2[%c0_1, %c0_2] : memref<2x128xf32, #tpu.memory_space<vmem>>, vector<2x128xf32>
    %2 = arith.mulf %0, %1 : vector<2x128xf32>
    %c0_3 = arith.constant 0 : index
    %c0_4 = arith.constant 0 : index
    %3 = vector.load %arg3[%c0_3, %c0_4] : memref<128x256xf32, #tpu.memory_space<vmem>>, vector<128x256xf32>
    %cst = arith.constant dense<0.000000e+00> : vector<2x256xf32>
    %4 = tpu.matmul %2, %3, %cst {dimension_numbers = #tpu.dot_dimension_numbers<[1], [0], [0], [1], [0, 0, 1, 1], [], []>} : vector<2x128xf32>, vector<128x256xf32>, vector<2x256xf32> -> vector<2x256xf32>
    %c0_5 = arith.constant 0 : index
    %c0_6 = arith.constant 0 : index
    %5 = vector.load %arg4[%c0_5, %c0_6] : memref<1x256xf32, #tpu.memory_space<vmem>>, vector<1x256xf32>
    %6 = vector.broadcast %5 : vector<1x256xf32> to vector<2x256xf32>
    %7 = arith.addf %4, %6 : vector<2x256xf32>
    %cst_7 = arith.constant 0.000000e+00 : f32
    %8 = vector.broadcast %cst_7 : f32 to vector<2x256xf32>
    %9 = arith.maximumf %7, %8 : vector<2x256xf32>
    %c0_8 = arith.constant 0 : index
    %c0_9 = arith.constant 0 : index
    %10 = vector.load %arg5[%c0_8, %c0_9] : memref<2x256xf32, #tpu.memory_space<vmem>>, vector<2x256xf32>
    tpu.vector_store %arg5[%c0_8, %c0_9], %9 {strides = array<i32>} : memref<2x256xf32, #tpu.memory_space<vmem>>, vector<2x256xf32>,
    return
  }
  func.func @transform_0(%arg0: i32) -> (i32, i32) {
    %c0_i32 = arith.constant 0 : i32
    %c0_i32_0 = arith.constant 0 : i32
    return %arg0, %c0_i32 : i32, i32
  }
  func.func @transform_1(%arg0: i32) -> (i32, i32) {
    %c0_i32 = arith.constant 0 : i32
    %c0_i32_0 = arith.constant 0 : i32
    return %arg0, %c0_i32 : i32, i32
  }
  func.func @transform_2(%arg0: i32) -> (i32, i32) {
    %c0_i32 = arith.constant 0 : i32
    %c0_i32_0 = arith.constant 0 : i32
    %c0_i32_1 = arith.constant 0 : i32
    return %c0_i32, %c0_i32_0 : i32, i32
  }
  func.func @transform_3(%arg0: i32) -> (i32, i32) {
    %c0_i32 = arith.constant 0 : i32
    %c0_i32_0 = arith.constant 0 : i32
    %c0_i32_1 = arith.constant 0 : i32
    return %c0_i32, %c0_i32_0 : i32, i32
  }
  func.func @transform_4(%arg0: i32) -> (i32, i32) {
    %c0_i32 = arith.constant 0 : i32
    %c0_i32_0 = arith.constant 0 : i32
    return %arg0, %c0_i32 : i32, i32
  }
}

</mosaic_0001>

<bundles_post_ra>
// kernel: tpu_custom_call.1
= control target key start
LH: loop header
LB: loop body
LE: loop exit
PB: predicated region body
PF: predicated region fallthrough
CT: control target
= control target key end

     0   :  { %9 = vsyncpa [#allocation3], 0  ;;  %s323_s0 = inlined_call_operand.hbm [shape: f32[2,128], index: 0, kind: input, shape index: {}]   ;;  %s324_s1 = inlined_call_operand.hbm [shape: f32[2,128], index: 1, kind: input, shape index: {}]   ;;  %s325_s2 = inlined_call_operand.hbm [shape: f32[128,256], index: 2, kind: input, shape index: {}]   ;;  %s326_s3 = inlined_call_operand.vmem [shape: f32[1,256], index: 3, kind: input, shape index: {}]   ;;  %s327_s4 = inlined_call_operand.hbm [shape: f32[2,256], index: 4, kind: output, shape index: {}]  }
   0x1   :  { %10 = vsyncpa [#allocation6], 0  ;;  %s28_s17 = sshll.u32 %s324_s1, 4  ;;  %s29_s17 = int_to_ptr.hbm [resolvable:$true] %s28_s17 }
   0x2   :  { %11 = vsyncpa [#allocation4], 0  ;;  %s277_s18 = smov [#allocation5]   ;;  %s17_s22 = sshll.u32 %s323_s0, 4  ;;  %s18_s22 = int_to_ptr.hbm [resolvable:$true] %s17_s22 }
   0x3   :  { %s30_s19 = sshll.u32 %s277_s18, 4  ;;  %s278_s23 = smov [#allocation2]   ;;  %s31_s19 = int_to_ptr.vmem [resolvable:$true] %s30_s19 }
   0x4   :  { %33 = dma.hbm_to_vmem [thread:$0]  %s29_s17, 32, %s31_s19, [#allocation6]  }
   0x5   :  { %s19_s24 = sshll.u32 %s278_s23, 4  ;;  %s38_s27 = sshll.u32 %s325_s2, 4  ;;  %s20_s24 = int_to_ptr.vmem [resolvable:$true] %s19_s24  ;;  %s39_s27 = int_to_ptr.hbm [resolvable:$true] %s38_s27 }
   0x6   :  { %22 = dma.hbm_to_vmem [thread:$0]  %s18_s22, 32, %s20_s24, [#allocation3]  }
   0x7   :  { %s279_s1 = smov [#allocation7]   ;;  %s280_s29 = smov 256  }
   0x8   :  { %s40_s28 = sshll.u32 %s279_s1, 4  ;;  %s281_s30 = smov 16   ;;  %s41_s28 = int_to_ptr.vmem [resolvable:$true] %s40_s28 }
   0x9   :  { %46 = dma.hbm_to_vmem [thread:$0]  %s39_s27, 4096, %s41_s28, [#allocation6], %s280_s29, %s280_s29, %s281_s30  }
   0xa   :  { %271 = dma.done.wait [#allocation3], 32  }
   0xb   :  { %272 = vsyncadd [#allocation3], 4294967264 }
   0xc   :  { %273 = dma.done.wait [#allocation6], 4128  }
   0xd   :  { %274 = vsyncadd [#allocation6], 4294963168  ;;  %v95_v0 = vld [vmem:[#allocation7 + $0xf8] sm:$0xff]  ;;  %v94_v1 = vld [vmem:[#allocation7 + $0xf0] sm:$0xff]  ;;  %s282_s5 = smov [#allocation8]   ;;  %s158_s9 = sshll.u32 %s327_s4, 4  ;;  %s159_s9 = int_to_ptr.hbm [resolvable:$true] %s158_s9 }
   0xe   :  { %v93_v2 = vld [vmem:[#allocation7 + $0xe8] sm:$0xff]  ;;  %122 = vmatpush.msra.mxu1 %v95_v0  ;;  %102 = vmatpush.msra.mxu0 %v94_v1  ;;  %v92_v3 = vld [vmem:[#allocation7 + $0xe0] sm:$0xff]  ;;  %v91_v4 = vld [vmem:[#allocation7 + $0xd8] sm:$0xff]  ;;  %s156_s6 = sshll.u32 %s282_s5, 4  ;;  %vm147_vm0 = vcmask 1041408   ;;  %s157_s6 = int_to_ptr.vmem [resolvable:$true] %s156_s6 }
   0xf   :  { %v90_v5 = vld [vmem:[#allocation7 + $0xd0] sm:$0xff]  ;;  %v89_v6 = vld [vmem:[#allocation7 + $0xc8] sm:$0xff]  ;;  %v88_v7 = vld [vmem:[#allocation7 + $0xc0] sm:$0xff] }
  0x10   :  { %123 = vmatpush.msra.mxu1 %v93_v2  ;;  %103 = vmatpush.msra.mxu0 %v92_v3  ;;  %v87_v8 = vld [vmem:[#allocation7 + $0xb8] sm:$0xff]  ;;  %v86_v9 = vld [vmem:[#allocation7 + $0xb0] sm:$0xff]  ;;  %v85_v10 = vld [vmem:[#allocation7 + $0xa8] sm:$0xff] }
  0x11   :  { %v84_v11 = vld [vmem:[#allocation7 + $0xa0] sm:$0xff]  ;;  %v83_v12 = vld [vmem:[#allocation7 + $0x98] sm:$0xff]  ;;  %v82_v13 = vld [vmem:[#allocation7 + $0x90] sm:$0xff] }
  0x12   :  { %124 = vmatpush.msra.mxu1 %v91_v4  ;;  %104 = vmatpush.msra.mxu0 %v90_v5  ;;  %v81_v14 = vld [vmem:[#allocation7 + $0x88] sm:$0xff]  ;;  %v80_v15 = vld [vmem:[#allocation7 + $0x80] sm:$0xff]  ;;  %v79_v16 = vld [vmem:[#allocation7 + $0x78] sm:$0xff] }
  0x13   :  { %v78_v17 = vld [vmem:[#allocation7 + $0x70] sm:$0xff]  ;;  %v77_v18 = vld [vmem:[#allocation7 + $0x68] sm:$0xff]  ;;  %v76_v19 = vld [vmem:[#allocation7 + $0x60] sm:$0xff] }
  0x14   :  { %125 = vmatpush.msra.mxu1 %v89_v6  ;;  %105 = vmatpush.msra.mxu0 %v88_v7  ;;  %v75_v20 = vld [vmem:[#allocation7 + $0x58] sm:$0xff]  ;;  %v74_v21 = vld [vmem:[#allocation7 + $0x50] sm:$0xff]  ;;  %v73_v22 = vld [vmem:[#allocation7 + $0x48] sm:$0xff] }
  0x15   :  { %v72_v23 = vld [vmem:[#allocation7 + $0x40] sm:$0xff]  ;;  %v71_v24 = vld [vmem:[#allocation7 + $0x38] sm:$0xff]  ;;  %v70_v25 = vld [vmem:[#allocation7 + $0x30] sm:$0xff] }
  0x16   :  { %126 = vmatpush.msra.mxu1 %v87_v8  ;;  %106 = vmatpush.msra.mxu0 %v86_v9  ;;  %v69_v26 = vld [vmem:[#allocation7 + $0x28] sm:$0xff]  ;;  %v68_v27 = vld [vmem:[#allocation7 + $0x20] sm:$0xff]  ;;  %v61_v28 = vld [vmem:[#allocation2] sm:$0x3] }
  0x17   :  { %v62_v29 = vld [vmem:[#allocation5] sm:$0x3]  ;;  %v66_v31 = vld [vmem:[#allocation7 + $0x10] sm:$0xff]  ;;  %v65_v32 = vld [vmem:[#allocation7 + $0x8] sm:$0xff] }
  0x18   :  { %127 = vmatpush.msra.mxu1 %v85_v10  ;;  %107 = vmatpush.msra.mxu0 %v84_v11  ;;  %v67_v30 = vld [vmem:[#allocation7 + $0x18] sm:$0xff]  ;;  %v63_v33 = vmul.f32 %v62_v29, %v61_v28  ;;  %v64_v34 = vld [vmem:[#allocation7] sm:$0xff] }
  0x19   :  { %v96_v35 = vld [vmem:[%s326_s3] sm:$0x3] }
  0x1a   :  { %128 = vmatpush.msra.mxu1 %v83_v12  ;;  %108 = vmatpush.msra.mxu0 %v82_v13  ;;  %v99_v36 = vperm.slane %v96_v35, 1  ;;  %v98_v37 = vperm.slane %v96_v35, 0 }
  0x1c   :  { %129 = vmatpush.msra.mxu1 %v81_v14  ;;  %109 = vmatpush.msra.mxu0 %v80_v15 }
  0x1e   :  { %130 = vmatpush.msra.mxu1 %v79_v16  ;;  %110 = vmatpush.msra.mxu0 %v78_v17 }
  0x20   :  { %131 = vmatpush.msra.mxu1 %v77_v18  ;;  %111 = vmatpush.msra.mxu0 %v76_v19 }
  0x22   :  { %132 = vmatpush.msra.mxu1 %v75_v20  ;;  %112 = vmatpush.msra.mxu0 %v74_v21 }
  0x24   :  { %133 = vmatpush.msra.mxu1 %v73_v22  ;;  %113 = vmatpush.msra.mxu0 %v72_v23 }
  0x26   :  { %134 = vmatpush.msra.mxu1 %v71_v24  ;;  %114 = vmatpush.msra.mxu0 %v70_v25 }
  0x28   :  { %135 = vmatpush.msra.mxu1 %v69_v26  ;;  %115 = vmatpush.msra.mxu0 %v68_v27 }
  0x2a   :  { %136 = vmatpush.msra.mxu1 %v67_v30  ;;  %116 = vmatpush.msra.mxu0 %v66_v31 }
  0x2c   :  { %137 = vmatpush.msra.mxu1 %v65_v32  ;;  %117 = vmatpush.msra.mxu0 %v64_v34 }
  0x2d   :  { %138 = vmatmul.f32.vlgmr.msra.gmra.mxu1 %v63_v33  ;;  %118 = vmatmul.f32.vlgmr.msra.gmra.mxu0 %v63_v33 }
  0xaa   :  { %v139_v38 = vpop.f32.mrf.mxu1  ;;  %v119_v39 = vpop.f32.mrf.mxu0 }
  0xab   :  { %v140_v40 = vadd.f32 %v139_v38, %v99_v36  ;;  %v120_v41 = vadd.f32 %v119_v39, %v98_v37 }
  0xad   :  { %v143_v42 = vmax.f32 %v140_v40, 0.0  ;;  %v142_v43 = vmax.f32 %v120_v41, 0.0 }
  0xaf   :  { %v146_v44 = vrot.slane %v143_v42, 6 }
  0xb1   :  { %v148_v45 = vsel %vm147_vm0, %v142_v43, %v146_v44 }
  0xb2   :  { %150 = vst [vmem:[#allocation8] sm:$0xf] %v148_v45 }
  0xb3   :  { %161 = dma.vmem_to_hbm [thread:$0]  %s157_s6, 64, %s159_s9, [#allocation4]  }
  0xb4   :  { %275 = dma.done.wait [#allocation4], 64  }
  0xb5   :  { %276 = vsyncadd [#allocation4], 4294967232 }
  0xb6   :  { %166 = vsyncpa [#allocation3], 1 }
  0xb7   :  { %167 = vsyncpa [#allocation6], 1 }
  0xb8   :  { %168 = vsyncpa [#allocation4], 1 }

</bundles_post_ra>
